<compile_context>
chip_gen: v6e
topology: v6e:2x2x1
jax: 0.10.0
libtpu: 0.0.40
codegen_flags: <defaults>
</compile_context>

<pallas_src>
import math
import numpy as np
import jax
import jax.numpy as jnp
from jax.experimental import pallas as pl
from jax.experimental.pallas import tpu as pltpu  # noqa: F401  (not needed for this tiny kernel)

B = 2        # batch
J = 16       # num joints (adjacency size)
F_IN = 2     # input features (2-D joint coordinates)
F_OUT = 128  # output features (lane-dense)
BJ = B * J
NEG = -9.0e15


# ---------------------------------------------------------------------------
# Pallas kernel: reassociated mix + single projection, whole layer in VMEM
# ---------------------------------------------------------------------------
def semgconv_kernel(x_ref, mix_ref, wb_ref, o_ref):
    x = x_ref[...]                                   # (B*J, F_IN)

    adj_block = mix_ref[:, 0:BJ]                     # (B*J, B*J) block-diag off-diagonal adj
    diag = mix_ref[:, BJ:BJ + 1]                     # (B*J, 1)   softmax diagonal per joint

    w0 = wb_ref[0:F_IN, :]                           # (F_IN, F_OUT)
    w1 = wb_ref[F_IN:2 * F_IN, :]                    # (F_IN, F_OUT)
    bias = wb_ref[2 * F_IN:2 * F_IN + 1, :]          # (1, F_OUT)

    # diagonal term: (adj*I) @ (x@W0) == (diag * x) @ W0   -> VPU row scale
    y0 = diag * x                                    # (B*J, F_IN)
    # off-diagonal term: (adj*(1-I)) @ (x@W1) == (adj_off @ x) @ W1
    y1 = jnp.dot(adj_block, x, preferred_element_type=jnp.float32)   # (B*J, F_IN)

    # single lane-dense (B*J, F_OUT) result, unmasked stores
    o_ref[...] = (jnp.dot(y0, w0, preferred_element_type=jnp.float32)
                  + jnp.dot(y1, w1, preferred_element_type=jnp.float32)
                  + bias)


# ---------------------------------------------------------------------------
# parameter-only preprocessing (hoisted out of the kernel)
# ---------------------------------------------------------------------------
def precompute_params(w, mask_f, e_dense, bias):
    """Compute the packed kernel parameters.  Depends only on the module's
    parameters (W, e, bias) and the fixed adjacency mask — NOT on the input x.
    For eval call once at init; for training recompute whenever e/W/bias change."""
    logits = jnp.where(mask_f > 0.5, e_dense, NEG)
    adj = jax.nn.softmax(logits, axis=1)                             # (J, J)
    eye = jnp.eye(J, dtype=jnp.float32)
    diag_vals = jnp.sum(adj * eye, axis=1, keepdims=True)            # (J, 1)
    adj_off = adj * (1.0 - eye)                                      # (J, J)

    adj_block = jnp.kron(jnp.eye(B, dtype=jnp.float32), adj_off)     # (B*J, B*J)
    diag_bj = jnp.tile(diag_vals, (B, 1))                            # (B*J, 1)
    mix = jnp.concatenate([adj_block, diag_bj], axis=1)              # (B*J, B*J + 1)

    wb = jnp.concatenate([w[0], w[1], bias], axis=0)                 # (2*F_IN + 1, F_OUT)
    return mix, wb


# ---------------------------------------------------------------------------
# wrapper
# ---------------------------------------------------------------------------
@jax.jit
def sem_graph_conv(x, mix, wb):
    x_flat = x.reshape(BJ, F_IN)             # fold batch into the sublane dim
    out_flat = pl.pallas_call(
        semgconv_kernel,
        out_shape=jax.ShapeDtypeStruct((BJ, F_OUT), jnp.float32),
    )(x_flat, mix, wb)
    return out_flat.reshape(B, J, F_OUT)


# ---------------------------------------------------------------------------
# deterministic synthetic parameters (module-consistent init)
# ---------------------------------------------------------------------------
def build_adjacency():
    # 16-joint human-skeleton-like tree + self loops
    edges = [(0, 1), (1, 2), (2, 3), (0, 4), (4, 5), (5, 6), (0, 7), (7, 8),
             (8, 9), (8, 10), (10, 11), (11, 12), (8, 13), (13, 14), (14, 15)]
    a = np.zeros((J, J), np.float32)
    for i, k in edges:
        a[i, k] = 1.0
        a[k, i] = 1.0
    a += np.eye(J, dtype=np.float32)
    return a


def init_params(key):
    adj_np = build_adjacency()
    mask_np = adj_np > 0
    rows, cols = np.nonzero(mask_np)        # row-major == torch bool-mask order
    nnz = rows.shape[0]

    kw, ke, kb = jax.random.split(key, 3)
    gain = 1.414
    a = gain * math.sqrt(6.0 / (F_IN + F_OUT))
    w = jax.random.uniform(kw, (2, F_IN, F_OUT), jnp.float32, -a, a)
    # module inits e to 1.0; randomize slightly for a non-trivial numeric test
    e = jax.random.uniform(ke, (nnz,), jnp.float32, 0.5, 1.5)
    stdv = 1.0 / math.sqrt(F_OUT)
    bias = jax.random.uniform(kb, (1, F_OUT), jnp.float32, -stdv, stdv)

    e_dense = jnp.zeros((J, J), jnp.float32).at[rows, cols].set(e)
    mask_f = jnp.asarray(mask_np, jnp.float32)
    return dict(w=w, e=e, e_dense=e_dense, mask_f=mask_f, bias=bias)


# ---------------------------------------------------------------------------
# pure-JAX reference of the same forward (correctness check)
# ---------------------------------------------------------------------------
def reference_forward(x, params):
    w = params["w"]
    h0 = x @ w[0]
    h1 = x @ w[1]
    logits = jnp.where(params["mask_f"] > 0.5, params["e_dense"], NEG)
    adj = jax.nn.softmax(logits, axis=1)
    m_eye = jnp.eye(J, dtype=jnp.float32)
    out = jnp.matmul(adj * m_eye, h0) + jnp.matmul(adj * (1.0 - m_eye), h1)
    return out + params["bias"].reshape(1, 1, F_OUT)


if __name__ == "__main__":
    key = jax.random.PRNGKey(0)
    pkey, xkey = jax.random.split(key)
    params = init_params(pkey)
    x = jax.random.normal(xkey, (B, J, F_IN), jnp.float32)   # [B, J, 2] 2-D joints

    # one-time (per parameter update) precompute of the packed kernel params
    mix, wb = precompute_params(params["w"], params["mask_f"],
                                params["e_dense"], params["bias"])

    out = sem_graph_conv(x, mix, wb)
    jax.block_until_ready(out)

    ref = reference_forward(x, params)
    assert out.shape == (B, J, F_OUT)
    err = float(jnp.max(jnp.abs(out - ref)))
    assert jnp.allclose(out, ref, rtol=2e-3, atol=2e-3), err
    print("KERNEL_OK")
</pallas_src>

<mosaic_0001>
module attributes {stable_mosaic.version = 11 : i64} {
  func.func @semgconv_kernel(%arg0: memref<32x2xf32, #tpu.memory_space<vmem>>, %arg1: memref<32x33xf32, #tpu.memory_space<vmem>>, %arg2: memref<5x128xf32, #tpu.memory_space<vmem>>, %arg3: memref<32x128xf32, #tpu.memory_space<vmem>>) attributes {dimension_semantics = [], scalar_prefetch = 0 : i64, scratch_operands = 0 : i64, tpu.core_type = #tpu.core_type<tc>} {
    %c0 = arith.constant 0 : index
    %c0_0 = arith.constant 0 : index
    %0 = vector.load %arg0[%c0, %c0_0] : memref<32x2xf32, #tpu.memory_space<vmem>>, vector<32x2xf32>
    %c0_1 = arith.constant 0 : index
    %c0_2 = arith.constant 0 : index
    %1 = vector.load %arg1[%c0_1, %c0_2] : memref<32x33xf32, #tpu.memory_space<vmem>>, vector<32x32xf32>
    %c0_3 = arith.constant 0 : index
    %c32 = arith.constant 32 : index
    %2 = vector.load %arg1[%c0_3, %c32] : memref<32x33xf32, #tpu.memory_space<vmem>>, vector<32x1xf32>
    %c0_4 = arith.constant 0 : index
    %c0_5 = arith.constant 0 : index
    %3 = vector.load %arg2[%c0_4, %c0_5] : memref<5x128xf32, #tpu.memory_space<vmem>>, vector<2x128xf32>
    %c2 = arith.constant 2 : index
    %c0_6 = arith.constant 0 : index
    %4 = vector.load %arg2[%c2, %c0_6] : memref<5x128xf32, #tpu.memory_space<vmem>>, vector<2x128xf32>
    %c4 = arith.constant 4 : index
    %c0_7 = arith.constant 0 : index
    %5 = vector.load %arg2[%c4, %c0_7] : memref<5x128xf32, #tpu.memory_space<vmem>>, vector<1x128xf32>
    %6 = vector.broadcast %2 : vector<32x1xf32> to vector<32x2xf32>
    %7 = arith.mulf %6, %0 : vector<32x2xf32>
    %cst = arith.constant dense<0.000000e+00> : vector<32x2xf32>
    %8 = tpu.matmul %1, %0, %cst {dimension_numbers = #tpu.dot_dimension_numbers<[1], [0], [0], [1], [0, 0, 1, 1], [], []>} : vector<32x32xf32>, vector<32x2xf32>, vector<32x2xf32> -> vector<32x2xf32>
    %cst_8 = arith.constant dense<0.000000e+00> : vector<32x128xf32>
    %9 = tpu.matmul %7, %3, %cst_8 {dimension_numbers = #tpu.dot_dimension_numbers<[1], [0], [0], [1], [0, 0, 1, 1], [], []>} : vector<32x2xf32>, vector<2x128xf32>, vector<32x128xf32> -> vector<32x128xf32>
    %cst_9 = arith.constant dense<0.000000e+00> : vector<32x128xf32>
    %10 = tpu.matmul %8, %4, %cst_9 {dimension_numbers = #tpu.dot_dimension_numbers<[1], [0], [0], [1], [0, 0, 1, 1], [], []>} : vector<32x2xf32>, vector<2x128xf32>, vector<32x128xf32> -> vector<32x128xf32>
    %11 = arith.addf %9, %10 : vector<32x128xf32>
    %12 = vector.broadcast %5 : vector<1x128xf32> to vector<32x128xf32>
    %13 = arith.addf %11, %12 : vector<32x128xf32>
    %c0_10 = arith.constant 0 : index
    %c0_11 = arith.constant 0 : index
    %14 = vector.load %arg3[%c0_10, %c0_11] : memref<32x128xf32, #tpu.memory_space<vmem>>, vector<32x128xf32>
    tpu.vector_store %arg3[%c0_10, %c0_11], %13 {strides = array<i32>} : memref<32x128xf32, #tpu.memory_space<vmem>>, vector<32x128xf32>,
    return
  }
}

</mosaic_0001>

<bundles_post_ra>
// kernel: sem_graph_conv.1
= control target key start
LH: loop header
LB: loop body
LE: loop exit
PB: predicated region body
PF: predicated region fallthrough
CT: control target
= control target key end

     0   :  { %vm50_vm0 = vcmask 261120   ;;  %v465_v3 = vmov 32   ;;  %s537_s0 = inlined_call_operand.vmem [shape: f32[32,2], index: 0, kind: input, shape index: {}]   ;;  %s538_s1 = inlined_call_operand.vmem [shape: f32[32,33], index: 1, kind: input, shape index: {}]   ;;  %s539_s2 = inlined_call_operand.vmem [shape: f32[5,128], index: 2, kind: input, shape index: {}]   ;;  %s540_s3 = inlined_call_operand.hbm [shape: f32[32,128], index: 3, kind: output, shape index: {}]  }
   0x1   :  { %v18_v0 = vld [vmem:[%s537_s0 + $0x18] sm:$0xff]  ;;  %v17_v1 = vld [vmem:[%s537_s0 + $0x10] sm:$0xff]  ;;  %v19_v2 = vld [vmem:[%s538_s1] sm:$0xff]  ;;  %441 = vset.pattern.permute.xlu0 %v465_v3 }
   0x2   :  { %407 = vmatprep.subr.mxu0 %v18_v0  ;;  %v16_v4 = vld [vmem:[%s537_s0 + $0x8] sm:$0xff]  ;;  %415 = vmatprep.mubr.msk.f32.mxu0 %vm50_vm0, %v19_v2 }
   0x3   :  { %408 = vmatpush3.msra.mxu0 %v18_v0 }
   0x4   :  { %8 = vsyncpa [#allocation3], 0  ;;  %409 = vmatprep.subr.mxu0 %v17_v1  ;;  %28 = vperm.xlu0 %441, %v19_v2   ;;  %v15_v5 = vld [vmem:[%s537_s0] sm:$0xff]  ;;  %v21_v6 = vld [vmem:[%s538_s1 + $0x10] sm:$0xff]  ;;  %vm157_vm1 = vcmask 1041408   ;;  %vm144_vm2 = vcmask 15360  }
   0x5   :  { %410 = vmatpush3.msra.mxu0 %v17_v1  ;;  %442 = vset.pattern.permute.xlu1 %v465_v3  ;;  %v20_v7 = vld [vmem:[%s538_s1 + $0x8] sm:$0xff]  ;;  %v22_v8 = vld [vmem:[%s538_s1 + $0x18] sm:$0xff]  ;;  %v24_v9 = vld [vmem:[%s539_s2 + $0x2] sm:$0x3]  ;;  %s466_s5 = smov [#allocation2]  }
   0x6   :  { %411 = vmatprep.subr.mxu0 %v16_v4  ;;  %38 = vperm.xlu1 %442, %v21_v6   ;;  %v23_v10 = vld [vmem:[%s539_s2] sm:$0x3]  ;;  %v388_v27 = vld [vmem:[%s539_s2 + $0x4] ss:$0 sm:$0xff]  ;;  %s363_s6 = sshll.u32 %s466_s5, 4  ;;  %s364_s6 = int_to_ptr.vmem [resolvable:$true] %s363_s6 }
   0x7   :  { %412 = vmatpush3.msra.mxu0 %v16_v4  ;;  %421 = vmatprep.subr.msk.mxu1 %vm157_vm1, %v24_v9  ;;  %s443_s2 = scalar_lea.vmem %s364_s6, 512  ;;  %p448_p1 = scmp.lt.s32.totalorder %s364_s6, %s364_s6 }
   0x8   :  { %413 = vmatprep.subr.mxu0 %v15_v5  ;;  %33 = vperm.xlu0 %441, %v20_v7   ;;  %p444_p0 = scmp.ne.s32.totalorder %s364_s6, %s443_s2  ;;  %p449_p2 = scmp.lt.s32.totalorder %s443_s2, %s443_s2 }
   0x9   :  { %414 = vmatpush3.msra.mxu0 %v15_v5  ;;  %422 = vmatpush3.msk.msra.mxu1 %vm157_vm1, %v24_v9 }
   0xa   :  { %416 = vmatmul.mubr.msk.f32.vlgmr.msra.gmra.mxu0 %vm50_vm0, %v20_v7  ;;  %43 = vperm.xlu1 %442, %v22_v8   ;;  %p450_p3 = por %p449_p2, %p448_p1 }
   0xb   :  { %418 = vmatprep.mubr.msk.f32.mxu0 %vm50_vm0, %v21_v6  ;;  %429 = vmatprep.subr.msk.mxu1 %vm157_vm1, %v23_v10 }
   0xc   :  { %p451_p4 = pnand %p450_p3, %p444_p0 }
   0xe   :  { %419 = vmatmul.mubr.msk.f32.gmra.mxu0 %vm50_vm0, %v22_v8 }
  0x7f   :  { %v29_v12 = vpop.permute.xlu0 %28 }
  0x80   :  { %v46_v15 = vmul.f32 %v29_v12, %v15_v5 }
  0x81   :  { %v39_v16 = vpop.permute.xlu1 %38 }
  0x82   :  { %v48_v19 = vmul.f32 %v39_v16, %v17_v1 }
  0x83   :  { %v34_v18 = vpop.permute.xlu0 %33 }
  0x84   :  { %v47_v20 = vmul.f32 %v34_v18, %v16_v4 }
  0x85   :  { %v44_v21 = vpop.permute.xlu1 %43 }
  0x86   :  { %v49_v22 = vmul.f32 %v44_v21, %v18_v0 }
  0xca   :  { %v417_v11 = vpop.f32.mrf.mxu0 }
  0xcc   :  { %v125_v13 = vpop.f32.mrf.mxu0 }
  0xcd   :  { %423 = vmatprep.mubr.msk.f32.mxu1 %vm144_vm2, %v125_v13 }
  0xce   :  { %v420_v14 = vpop.f32.mrf.mxu0  ;;  %424 = vmatmul.mubr.msk.f32.vlgmr.msra.gmra.mxu1 %vm144_vm2, %v417_v11 }
  0xcf   :  { %430 = vmatpush3.msk.msra.mxu1 %vm157_vm1, %v23_v10 }
  0xd0   :  { %v135_v17 = vpop.f32.mrf.mxu0 }
  0xd1   :  { %426 = vmatprep.mubr.msk.f32.mxu1 %vm144_vm2, %v135_v17 }
  0xd2   :  { %427 = vmatmul.mubr.msk.f32.gmra.mxu1 %vm144_vm2, %v420_v14 }
  0xd3   :  { %431 = vmatprep.mubr.msk.f32.mxu1 %vm144_vm2, %v46_v15 }
  0xd6   :  { %432 = vmatmul.mubr.msk.f32.vlgmr.msra.gmra.mxu1 %vm144_vm2, %v47_v20 }
  0xd7   :  { %434 = vmatprep.mubr.msk.f32.mxu1 %vm144_vm2, %v48_v19 }
  0xda   :  { %435 = vmatmul.mubr.msk.f32.gmra.mxu1 %vm144_vm2, %v49_v22 }
 0x18e   :  { %v425_v23 = vpop.f32.mrf.mxu1 }
 0x190   :  { %v227_v24 = vpop.f32.mrf.mxu1 }
 0x192   :  { %v428_v25 = vpop.f32.mrf.mxu1 }
 0x194   :  { %v237_v26 = vpop.f32.mrf.mxu1 }
 0x196   :  { %v433_v28 = vpop.f32.mrf.mxu1 }
 0x197   :  { %v333_v29 = vadd.f32 %v433_v28, %v425_v23 }
 0x198   :  { %v327_v30 = vpop.f32.mrf.mxu1 }
 0x199   :  { %v351_v31 = vadd.f32 %v388_v27, %v333_v29  ;;  %v328_v32 = vadd.f32 %v327_v30, %v227_v24 }
 0x19a   :  { %v436_v33 = vpop.f32.mrf.mxu1 }
 0x19b   :  { %355 = vst [vmem:[#allocation2 + $0x8] sm:$0xff] %v351_v31  ;;  %v350_v34 = vadd.f32 %v388_v27, %v328_v32  ;;  %v343_v35 = vadd.f32 %v436_v33, %v428_v25 }
 0x19c   :  { %v337_v36 = vpop.f32.mrf.mxu1 }
 0x19d   :  { %354 = vst [vmem:[#allocation2] sm:$0xff] %v350_v34  ;;  %v353_v37 = vadd.f32 %v388_v27, %v343_v35  ;;  %v338_v38 = vadd.f32 %v337_v36, %v237_v26 }
 0x19f   :  { %357 = vst [vmem:[#allocation2 + $0x18] sm:$0xff] %v353_v37  ;;  %v352_v39 = vadd.f32 %v388_v27, %v338_v38 }
 0x1a1   :  { %356 = vst [vmem:[#allocation2 + $0x10] sm:$0xff] %v352_v39 }
 0x1a2   :  { %454 = shalt.err (!%p451_p4)
}
 0x1a3   :  { %s467_s7 = smov 128   ;;  %s468_s8 = smov 8  }
 0x1a4   :  { %369 = dma.vmem_to_hbm [thread:$0]  %s364_s6, 512, %s540_s3, [#allocation3], %s467_s7, %s467_s7, %s468_s8  }
 0x1a5   :  { %463 = dma.done.wait [#allocation3], 512  }
 0x1a6   :  { %464 = vsyncadd [#allocation3], 4294966784 }
 0x1a7   :  { %373 = vsyncpa [#allocation3], 1 }

</bundles_post_ra>
